<compile_context>
chip_gen: v7x
topology: tpu7x:2x2x1
jax: 0.10.0
libtpu: 0.0.40
codegen_flags: <defaults>
</compile_context>

<pallas_src>
import functools
import math

import jax
import jax.numpy as jnp
import numpy as np
from jax import lax
from jax.experimental import pallas as pl
from jax.experimental.pallas import tpu as pltpu

EEG_CH = 14                 # conv kernel height == input height
C_OUT = 16                  # first_layer_out_channel
KH, KW = EEG_CH, 3
PAD_H = int(math.ceil((KH - 1) / 2))   # 7
PAD_W = int(math.ceil((KW - 1) / 2))   # 1
NEG_SLOPE = 0.1             # nn.LeakyReLU(negative_slope=0.1) in the module
BN_EPS = 1e-5
ADAPT = 9                   # AdaptiveAvgPool2d((9, 9))
KSUB = 48                   # contraction dim: KH*KW = 42 padded up to a multiple of 8
HC = EEG_CH + 2 * PAD_H - KH + 1       # conv output height = 15
HP = HC // 2                           # height after MaxPool2d(2,2) = 7
ROWS = 2 * HP * C_OUT                  # 224 conv-output rows used: (h parity, h//2, c_out)
HIGH = lax.Precision.HIGHEST


def adaptive_pool_matrix(in_size, out_size):
    """Averaging matrix [out, in] reproducing torch AdaptiveAvgPool bin boundaries."""
    m = np.zeros((out_size, in_size), dtype=np.float32)
    for i in range(out_size):
        s = (i * in_size) // out_size
        e = -((-(i + 1) * in_size) // out_size)    # ceil((i+1)*in/out)
        m[i, s:e] = 1.0 / float(e - s)
    return m


def _pick_batch(n, wp):
    """Samples per grid step: B*wp must be a 128-lane multiple; keep VMEM modest."""
    base = 128 // math.gcd(wp, 128)        # minimal B for lane alignment
    min_blocks = -(-n // base)
    b = base * max(1, min(max(1, 64 // base), max(1, min_blocks // 2)))

    def est_vmem_bytes(bb):
        lb = bb * wp
        bp = -(-bb // 128) * 128
        elems = (2 * 2 * KSUB * 2 * lb                               # double-buffered A
                 + 2 * (HP * C_OUT * lb + lb * bp + ROWS * KSUB)     # resident constants
                 + 3 * ROWS * 2 * lb)                                # live intermediates
        return elems * 4

    while b > base and est_vmem_bytes(b) > 12 * 2**20:               # v5e scoped-VMEM safe
        b -= base
    return b


# ---- Fused kernel: conv(+bias+BN) matmul -> LeakyReLU -> 2x2 MaxPool -> (pool+FC fold) ----
def fused_cnn_kernel(a_ref, w2_ref, shift_ref, g_ref, sel_ref, o_ref, *, lb):
    # a_ref:    [1, 48, 2*lb]  width-only patches; rows=(kh,kw), lanes=(w-parity, sample, w/2)
    # w2_ref:   [224, 48]      BN-folded conv weights; rows=(h-parity, h/2, c_out)
    # shift_ref:[224, 1]       folded conv-bias + BN shift (per c_out, tiled over rows)
    # g_ref:    [112, lb]      folded AdaptiveAvgPool(9,9)+flatten+Linear weights (tiled over B)
    # sel_ref:  [lb, bp]       per-sample ones selector (sums each wp-wide lane chunk)
    # o_ref:    [1, 1, bp]     B per-sample scalars packed into one lane row
    z = jnp.dot(w2_ref[...], a_ref[0], preferred_element_type=jnp.float32)   # [224, 2*lb]
    z = z + shift_ref[...]                          # conv bias + BatchNorm(eval) folded shift
    z = jnp.maximum(z, NEG_SLOPE * z)               # LeakyReLU(0.1); Dropout identity (eval)
    zw = jnp.maximum(z[:, :lb], z[:, lb:])          # MaxPool over w: parity lane halves
    p = jnp.maximum(zw[:HP * C_OUT, :], zw[HP * C_OUT:, :])   # MaxPool over h: parity rows
    q = p * g_ref[...]                              # folded adaptive-pool + FC weights
    s = jnp.dot(q, sel_ref[...], preferred_element_type=jnp.float32)         # [112, bp]
    o_ref[...] = jnp.sum(s, axis=0, keepdims=True)[None]                     # [1, 1, bp]


def simplified_cnn_forward(x, params):
    n, cin, h_in, w_in = x.shape
    assert cin == 1 and h_in == EEG_CH and w_in >= 2
    wc = w_in + 2 * PAD_W - KW + 1        # conv output width == w_in
    wp = wc // 2                          # width after MaxPool2d(2,2)

    B = _pick_batch(n, wp)                # samples per grid step
    nblocks = -(-n // B)
    n_pad = nblocks * B
    lb = B * wp                           # per-block lane slab (multiple of 128)
    bp = -(-B // 128) * 128               # lane-padded per-block output width

    # ---- fold conv bias + BatchNorm (eval) into the conv weights (exact algebra, f32) ----
    scale = params['bn_gamma'] * lax.rsqrt(params['bn_var'] + BN_EPS)             # [16]
    wk = params['w_conv'][:, 0] * scale[:, None, None]                            # [16, 14, 3]
    shift = ((params['b_conv'] - params['bn_mean']) * scale
             + params['bn_beta']).reshape(C_OUT, 1)                               # [16, 1]
    shift2 = jnp.tile(shift, (2 * HP, 1))                                         # [224, 1]

    # ---- fold the conv-height loop into the weight matrix:
    #      W2[(hpar, hp, c), (r, kw)] = wk[c, r + PAD_H - h, kw],  h = 2*hp + hpar
    h_arr = jnp.arange(2 * HP)
    r_arr = jnp.arange(KH)
    kh = r_arr[None, :] + PAD_H - h_arr[:, None]                                  # [14, 14]
    valid = ((kh >= 0) & (kh < KH)).astype(jnp.float32)
    w_hcrk = wk[:, jnp.clip(kh, 0, KH - 1), :] * valid[None, :, :, None]          # [16,14,14,3]
    w2 = (w_hcrk.transpose(1, 0, 2, 3)                    # [h, c, r, kw]
          .reshape(HP, 2, C_OUT, KH, KW)                  # h -> (hp, hpar)
          .transpose(1, 0, 2, 3, 4)                       # [hpar, hp, c, r, kw]
          .reshape(ROWS, KH * KW))
    w2 = jnp.pad(w2, ((0, 0), (0, KSUB - KH * KW)))                               # [224, 48]

    # ---- fold AdaptiveAvgPool2d((9,9)) + flatten + Linear into one G tensor ----
    ph = jnp.asarray(adaptive_pool_matrix(HP, ADAPT))                             # [9, 7]
    pw = jnp.asarray(adaptive_pool_matrix(wp, ADAPT))                             # [9, wp]
    wfc = params['w_fc'].reshape(C_OUT, ADAPT, ADAPT)                             # (c, i, j)
    g = jnp.einsum('cij,ih,jw->chw', wfc, ph, pw, precision=HIGH)                 # [16, 7, wp]
    g_rows = g.transpose(1, 0, 2).reshape(HP * C_OUT, wp)                         # [112, wp]
    g_tiled = jnp.tile(g_rows, (1, B))                                            # [112, lb]

    # per-sample ones selector: sums each wp-wide lane chunk into one output lane
    sel = jnp.repeat(jnp.eye(B, dtype=jnp.float32), wp, axis=0)                   # [lb, B]
    sel = jnp.pad(sel, ((0, 0), (0, bp - B)))                                     # [lb, bp]

    # ---- width-only, maxpool-parity-split patch slab (no 42x im2col; ~15 XLA ops) ----
    xw = jnp.pad(x[:, 0], ((0, n_pad - n), (0, 0), (PAD_W, PAD_W + 1)))           # [n_pad,14,W+3]
    slabs = [xw[:, :, par + kw: par + kw + 2 * wp: 2]                             # [n_pad,14,wp]
             for kw in range(KW) for par in range(2)]
    a = (jnp.stack(slabs, axis=0).reshape(KW, 2, n_pad, KH, wp)
         .transpose(3, 0, 1, 2, 4)                        # [r, kw, par, n_pad, wp]
         .reshape(KH * KW, 2, n_pad, wp))
    a = jnp.pad(a, ((0, KSUB - KH * KW), (0, 0), (0, 0), (0, 0)))                 # [48,2,n_pad,wp]
    a = (a.reshape(KSUB, 2, nblocks, B, wp)
         .transpose(2, 0, 1, 3, 4)                        # [nblocks, 48, par, B, wp]
         .reshape(nblocks, KSUB, 2 * lb))

    kernel = functools.partial(fused_cnn_kernel, lb=lb)
    out_pad = pl.pallas_call(
        kernel,
        out_shape=jax.ShapeDtypeStruct((nblocks, 1, bp), jnp.float32),
        grid=(nblocks,),
        in_specs=[
            pl.BlockSpec((1, KSUB, 2 * lb), lambda i: (i, 0, 0)),
            pl.BlockSpec((ROWS, KSUB), lambda i: (0, 0)),
            pl.BlockSpec((ROWS, 1), lambda i: (0, 0)),
            pl.BlockSpec((HP * C_OUT, lb), lambda i: (0, 0)),
            pl.BlockSpec((lb, bp), lambda i: (0, 0)),
        ],
        out_specs=pl.BlockSpec((1, 1, bp), lambda i: (i, 0, 0)),
        compiler_params=pltpu.CompilerParams(
            dimension_semantics=("parallel",)),
    )(a, w2, shift2, g_tiled, sel)

    # fc bias added once here (cheaper than shipping a (1,1) block into the kernel)
    return out_pad[:, 0, :B].reshape(n_pad)[:n, None] + params['b_fc'][None, :]


def reference_forward(x, params):
    """Pure-JAX reference of the same (eval-mode) forward pass (unfused, f32-exact)."""
    z = lax.conv_general_dilated(
        x, params['w_conv'], window_strides=(1, 1),
        padding=((PAD_H, PAD_H), (PAD_W, PAD_W)),
        dimension_numbers=('NCHW', 'OIHW', 'NCHW'), precision=HIGH)
    z = z + params['b_conv'][None, :, None, None]
    inv = lax.rsqrt(params['bn_var'] + BN_EPS)[None, :, None, None]
    z = (z - params['bn_mean'][None, :, None, None]) * inv
    z = z * params['bn_gamma'][None, :, None, None] + params['bn_beta'][None, :, None, None]
    z = jnp.where(z >= 0, z, NEG_SLOPE * z)
    n, c, hc, wc = z.shape
    hp, wp = hc // 2, wc // 2
    z = z[:, :, :2 * hp, :2 * wp].reshape(n, c, hp, 2, wp, 2).max(axis=(3, 5))
    ph = jnp.asarray(adaptive_pool_matrix(hp, ADAPT))
    pw = jnp.asarray(adaptive_pool_matrix(wp, ADAPT))
    z = jnp.einsum('ih,nchw->nciw', ph, z, precision=HIGH)
    z = jnp.einsum('jw,nciw->ncij', pw, z, precision=HIGH)
    flat = z.reshape(n, -1)
    return jnp.dot(flat, params['w_fc'].T, precision=HIGH) + params['b_fc'][None, :]


if __name__ == "__main__":
    key = jax.random.PRNGKey(0)
    kx, *kp = jax.random.split(key, 9)
    N, W = 2, 32
    x = jax.random.normal(kx, (N, 1, EEG_CH, W), jnp.float32)
    params = dict(
        w_conv=0.1 * jax.random.normal(kp[0], (C_OUT, 1, KH, KW), jnp.float32),
        b_conv=0.1 * jax.random.normal(kp[1], (C_OUT,), jnp.float32),
        bn_gamma=1.0 + 0.1 * jax.random.normal(kp[2], (C_OUT,), jnp.float32),
        bn_beta=0.1 * jax.random.normal(kp[3], (C_OUT,), jnp.float32),
        bn_mean=0.1 * jax.random.normal(kp[4], (C_OUT,), jnp.float32),
        bn_var=0.5 + jnp.abs(jax.random.normal(kp[5], (C_OUT,), jnp.float32)),
        w_fc=0.03 * jax.random.normal(kp[6], (1, ADAPT * ADAPT * C_OUT), jnp.float32),
        b_fc=0.1 * jax.random.normal(kp[7], (1,), jnp.float32),
    )

    out = jax.jit(simplified_cnn_forward)(x, params)
    out = jax.block_until_ready(out)
    assert out.shape == (N, 1)

    ref = reference_forward(x, params)
    np.testing.assert_allclose(np.asarray(out), np.asarray(ref), rtol=2e-4, atol=2e-4)
    print("KERNEL_OK")
</pallas_src>

<mosaic_0001>
module attributes {stable_mosaic.version = 11 : i64} {
  func.func @fused_cnn_kernel(%arg0: i32, %arg1: memref<1x48x256xf32, #tpu.memory_space<vmem>>, %arg2: memref<224x48xf32, #tpu.memory_space<vmem>>, %arg3: memref<224x1xf32, #tpu.memory_space<vmem>>, %arg4: memref<112x128xf32, #tpu.memory_space<vmem>>, %arg5: memref<128x128xf32, #tpu.memory_space<vmem>>, %arg6: memref<1x1x128xf32, #tpu.memory_space<vmem>>) attributes {dimension_semantics = [#tpu.dimension_semantics<parallel>], iteration_bounds = array<i64: 1>, scalar_prefetch = 0 : i64, scratch_operands = 0 : i64, tpu.core_type = #tpu.core_type<tc>, window_params = [{transform_indices = @transform_0, window_bounds = array<i64: 1, 48, 256>}, {pipeline_mode = #tpu.pipeline_mode<synchronous>, transform_indices = @transform_1, window_bounds = array<i64: 224, 48>}, {pipeline_mode = #tpu.pipeline_mode<synchronous>, transform_indices = @transform_2, window_bounds = array<i64: 224, 1>}, {pipeline_mode = #tpu.pipeline_mode<synchronous>, transform_indices = @transform_3, window_bounds = array<i64: 112, 128>}, {pipeline_mode = #tpu.pipeline_mode<synchronous>, transform_indices = @transform_4, window_bounds = array<i64: 128, 128>}, {transform_indices = @transform_5, window_bounds = array<i64: 1, 1, 128>}]} {
    %c0 = arith.constant 0 : index
    %c0_0 = arith.constant 0 : index
    %0 = vector.load %arg2[%c0, %c0_0] : memref<224x48xf32, #tpu.memory_space<vmem>>, vector<224x48xf32>
    %c0_1 = arith.constant 0 : index
    %c0_2 = arith.constant 0 : index
    %c0_3 = arith.constant 0 : index
    %1 = vector.load %arg1[%c0_1, %c0_2, %c0_3] : memref<1x48x256xf32, #tpu.memory_space<vmem>>, vector<1x48x256xf32>
    %2 = vector.shape_cast %1 : vector<1x48x256xf32> to vector<48x256xf32>
    %cst = arith.constant dense<0.000000e+00> : vector<224x256xf32>
    %3 = tpu.matmul %0, %2, %cst {dimension_numbers = #tpu.dot_dimension_numbers<[1], [0], [0], [1], [0, 0, 1, 1], [], []>} : vector<224x48xf32>, vector<48x256xf32>, vector<224x256xf32> -> vector<224x256xf32>
    %c0_4 = arith.constant 0 : index
    %c0_5 = arith.constant 0 : index
    %4 = vector.load %arg3[%c0_4, %c0_5] : memref<224x1xf32, #tpu.memory_space<vmem>>, vector<224x1xf32>
    %5 = vector.broadcast %4 : vector<224x1xf32> to vector<224x256xf32>
    %6 = arith.addf %3, %5 : vector<224x256xf32>
    %cst_6 = arith.constant 1.000000e-01 : f32
    %7 = vector.broadcast %cst_6 : f32 to vector<224x256xf32>
    %8 = arith.mulf %7, %6 : vector<224x256xf32>
    %9 = arith.maximumf %6, %8 : vector<224x256xf32>
    %10 = vector.extract_strided_slice %9 {offsets = [0, 0], sizes = [224, 128], strides = [1, 1]} : vector<224x256xf32> to vector<224x128xf32>
    %11 = vector.extract_strided_slice %9 {offsets = [0, 128], sizes = [224, 128], strides = [1, 1]} : vector<224x256xf32> to vector<224x128xf32>
    %12 = arith.maximumf %10, %11 : vector<224x128xf32>
    %13 = vector.extract_strided_slice %12 {offsets = [0, 0], sizes = [112, 128], strides = [1, 1]} : vector<224x128xf32> to vector<112x128xf32>
    %14 = vector.extract_strided_slice %12 {offsets = [112, 0], sizes = [112, 128], strides = [1, 1]} : vector<224x128xf32> to vector<112x128xf32>
    %15 = arith.maximumf %13, %14 : vector<112x128xf32>
    %c0_7 = arith.constant 0 : index
    %c0_8 = arith.constant 0 : index
    %16 = vector.load %arg4[%c0_7, %c0_8] : memref<112x128xf32, #tpu.memory_space<vmem>>, vector<112x128xf32>
    %17 = arith.mulf %15, %16 : vector<112x128xf32>
    %c0_9 = arith.constant 0 : index
    %c0_10 = arith.constant 0 : index
    %18 = vector.load %arg5[%c0_9, %c0_10] : memref<128x128xf32, #tpu.memory_space<vmem>>, vector<128x128xf32>
    %cst_11 = arith.constant dense<0.000000e+00> : vector<112x128xf32>
    %19 = tpu.matmul %17, %18, %cst_11 {dimension_numbers = #tpu.dot_dimension_numbers<[1], [0], [0], [1], [0, 0, 1, 1], [], []>} : vector<112x128xf32>, vector<128x128xf32>, vector<112x128xf32> -> vector<112x128xf32>
    %cst_12 = arith.constant dense<0.000000e+00> : vector<128xf32>
    %20 = vector.multi_reduction <add>, %19, %cst_12 [0] : vector<112x128xf32> to vector<128xf32>
    %21 = vector.shape_cast %20 : vector<128xf32> to vector<1x128xf32>
    %22 = vector.shape_cast %21 : vector<1x128xf32> to vector<1x1x128xf32>
    %c0_13 = arith.constant 0 : index
    %c0_14 = arith.constant 0 : index
    %c0_15 = arith.constant 0 : index
    %23 = vector.load %arg6[%c0_13, %c0_14, %c0_15] : memref<1x1x128xf32, #tpu.memory_space<vmem>>, vector<1x1x128xf32>
    tpu.vector_store %arg6[%c0_13, %c0_14, %c0_15], %22 {strides = array<i32>} : memref<1x1x128xf32, #tpu.memory_space<vmem>>, vector<1x1x128xf32>,
    return
  }
  func.func @transform_0(%arg0: i32) -> (i32, i32, i32) {
    %c0_i32 = arith.constant 0 : i32
    %c0_i32_0 = arith.constant 0 : i32
    %c0_i32_1 = arith.constant 0 : i32
    return %arg0, %c0_i32, %c0_i32_0 : i32, i32, i32
  }
  func.func @transform_1(%arg0: i32) -> (i32, i32) {
    %c0_i32 = arith.constant 0 : i32
    %c0_i32_0 = arith.constant 0 : i32
    %c0_i32_1 = arith.constant 0 : i32
    return %c0_i32, %c0_i32_0 : i32, i32
  }
  func.func @transform_2(%arg0: i32) -> (i32, i32) {
    %c0_i32 = arith.constant 0 : i32
    %c0_i32_0 = arith.constant 0 : i32
    %c0_i32_1 = arith.constant 0 : i32
    return %c0_i32, %c0_i32_0 : i32, i32
  }
  func.func @transform_3(%arg0: i32) -> (i32, i32) {
    %c0_i32 = arith.constant 0 : i32
    %c0_i32_0 = arith.constant 0 : i32
    %c0_i32_1 = arith.constant 0 : i32
    return %c0_i32, %c0_i32_0 : i32, i32
  }
  func.func @transform_4(%arg0: i32) -> (i32, i32) {
    %c0_i32 = arith.constant 0 : i32
    %c0_i32_0 = arith.constant 0 : i32
    %c0_i32_1 = arith.constant 0 : i32
    return %c0_i32, %c0_i32_0 : i32, i32
  }
  func.func @transform_5(%arg0: i32) -> (i32, i32, i32) {
    %c0_i32 = arith.constant 0 : i32
    %c0_i32_0 = arith.constant 0 : i32
    %c0_i32_1 = arith.constant 0 : i32
    return %arg0, %c0_i32, %c0_i32_0 : i32, i32, i32
  }
}

</mosaic_0001>

<bundles_post_ra>
// kernel: simplified_cnn_forward.1
= control target key start
LH: loop header
LB: loop body
LE: loop exit
PB: predicated region body
PF: predicated region fallthrough
CT: control target
= control target key end

     0   :  { %v1068_v3 = vmov 0.0   ;;  %v1069_v8 = vmov 0   ;;  %vm228_vm0 = vcmask 392192   ;;  %s1611_s0 = inlined_call_operand.vmem [shape: f32[1,48,256], index: 0, kind: input, shape index: {}]   ;;  %s1612_s1 = inlined_call_operand.vmem [shape: f32[224,48], index: 1, kind: input, shape index: {}]   ;;  %s1613_s2 = inlined_call_operand.vmem [shape: f32[224,1], index: 2, kind: input, shape index: {}]   ;;  %s1614_s4 = inlined_call_operand.vmem [shape: f32[128,128], index: 4, kind: input, shape index: {}]   ;;  %s1615_s3 = inlined_call_operand.vmem [shape: f32[112,128], index: 3, kind: input, shape index: {}]   ;;  %s1616_s5 = inlined_call_operand.vmem [shape: f32[1,1,128], index: 5, kind: output, shape index: {}]  }
   0x1   :  { %v49_v0 = vld [vmem:[%s1611_s0 + $0x8] sm:$0xff]  ;;  %v51_v1 = vld [vmem:[%s1611_s0 + $0x18] sm:$0xff]  ;;  %v48_v2 = vld [vmem:[%s1611_s0] sm:$0xff]  ;;  %377 = vmatprep.mubr.f32.mxu0 %v1068_v3  ;;  %485 = vmatprep.mubr.f32.mxu1 %v1068_v3 }
   0x2   :  { %v1014_v4 = vpack.c.bf16 %v51_v1, %v49_v0  ;;  %v50_v5 = vld [vmem:[%s1611_s0 + $0x10] sm:$0xff]  ;;  %v53_v6 = vld [vmem:[%s1611_s0 + $0x28] sm:$0xff]  ;;  %v55_v7 = vld [vmem:[%s1611_s0 + $0x38] sm:$0xff]  ;;  %1067 = vset.pattern.permute.xlu1 %v1069_v8  ;;  %1066 = vset.pattern.permute.xlu0 %v1069_v8 }
   0x3   :  { %v1016_v9 = vpack.c.bf16 %v50_v5, %v48_v2  ;;  %v1018_v10 = vpack.c.bf16 %v55_v7, %v53_v6  ;;  %v52_v11 = vld [vmem:[%s1611_s0 + $0x20] sm:$0xff]  ;;  %v54_v12 = vld [vmem:[%s1611_s0 + $0x30] sm:$0xff]  ;;  %v57_v13 = vld [vmem:[%s1611_s0 + $0x48] sm:$0xff] }
   0x4   :  { %1015 = vmatprep.subr.bf16.mxu0 %v1014_v4  ;;  %1058 = vmatprep.subr.bf16.mxu1 %v1014_v4  ;;  %v59_v14 = vld [vmem:[%s1611_s0 + $0x58] sm:$0xff]  ;;  %v1020_v15 = vpack.c.bf16 %v54_v12, %v52_v11  ;;  %v56_v17 = vld [vmem:[%s1611_s0 + $0x40] sm:$0xff]  ;;  %v58_v18 = vld [vmem:[%s1611_s0 + $0x50] sm:$0xff] }
   0x5   :  { %1017 = vmatpush1.bf16.msra.mxu0 %v1016_v9  ;;  %1061 = vmatpush1.bf16.msra.mxu1 %v1016_v9  ;;  %v1022_v16 = vpack.c.bf16 %v59_v14, %v57_v13  ;;  %v1024_v19 = vpack.c.bf16 %v58_v18, %v56_v17  ;;  %v20_v20 = vld [vmem:[%s1612_s1] sm:$0xff]  ;;  %v38_v21 = vld [vmem:[%s1612_s1 + $0x90] sm:$0xff]  ;;  %v61_v22 = vld [vmem:[%s1613_s2 + $0x8] sm:$0xff] }
   0x6   :  { %1019 = vmatprep.subr.bf16.mxu0 %v1018_v10  ;;  %1059 = vmatprep.subr.bf16.mxu1 %v1018_v10  ;;  %v60_v23 = vld [vmem:[%s1613_s2] sm:$0xff]  ;;  %v75_v24 = vld [vmem:[%s1613_s2 + $0x78] sm:$0xff]  ;;  %v74_v25 = vld [vmem:[%s1613_s2 + $0x70] sm:$0xff] }
   0x7   :  { %95 = vperm.xlu1 %1067, %v61_v22   ;;  %90 = vperm.xlu0 %1066, %v60_v23   ;;  %v21_v26 = vld [vmem:[%s1612_s1 + $0x8] sm:$0xff]  ;;  %v39_v27 = vld [vmem:[%s1612_s1 + $0x98] sm:$0xff]  ;;  %v76_v28 = vld [vmem:[%s1613_s2 + $0x80] sm:$0xff] }
   0x8   :  { %v62_v29 = vld [vmem:[%s1613_s2 + $0x10] sm:$0xff]  ;;  %v40_v31 = vld [vmem:[%s1612_s1 + $0xa0] sm:$0xff]  ;;  %v77_v32 = vld [vmem:[%s1613_s2 + $0x88] sm:$0xff] }
   0x9   :  { %1021 = vmatpush1.bf16.msra.mxu0 %v1020_v15  ;;  %1062 = vmatpush1.bf16.msra.mxu1 %v1020_v15  ;;  %v22_v30 = vld [vmem:[%s1612_s1 + $0x10] sm:$0xff]  ;;  %v63_v33 = vld [vmem:[%s1613_s2 + $0x18] sm:$0xff]  ;;  %v41_v35 = vld [vmem:[%s1612_s1 + $0xa8] sm:$0xff] }
   0xa   :  { %1023 = vmatprep.subr.bf16.mxu0 %v1022_v16  ;;  %1060 = vmatprep.subr.bf16.mxu1 %v1022_v16  ;;  %v23_v34 = vld [vmem:[%s1612_s1 + $0x18] sm:$0xff]  ;;  %v78_v36 = vld [vmem:[%s1613_s2 + $0x90] sm:$0xff]  ;;  %v64_v37 = vld [vmem:[%s1613_s2 + $0x20] sm:$0xff] }
   0xb   :  { %165 = vperm.xlu1 %1067, %v75_v24   ;;  %160 = vperm.xlu0 %1066, %v74_v25   ;;  %v24_v38 = vld [vmem:[%s1612_s1 + $0x20] sm:$0xff]  ;;  %v42_v39 = vld [vmem:[%s1612_s1 + $0xb0] sm:$0xff]  ;;  %v79_v40 = vld [vmem:[%s1613_s2 + $0x98] sm:$0xff] }
   0xc   :  { %v65_v41 = vld [vmem:[%s1613_s2 + $0x28] sm:$0xff]  ;;  %v43_v43 = vld [vmem:[%s1612_s1 + $0xb8] sm:$0xff]  ;;  %v80_v44 = vld [vmem:[%s1613_s2 + $0xa0] sm:$0xff] }
   0xd   :  { %1025 = vmatpush1.bf16.msra.mxu0 %v1024_v19  ;;  %1063 = vmatpush1.bf16.msra.mxu1 %v1024_v19  ;;  %v25_v42 = vld [vmem:[%s1612_s1 + $0x28] sm:$0xff]  ;;  %v66_v45 = vld [vmem:[%s1613_s2 + $0x30] sm:$0xff]  ;;  %v44_v47 = vld [vmem:[%s1612_s1 + $0xc0] sm:$0xff] }
   0xe   :  { %v26_v46 = vld [vmem:[%s1612_s1 + $0x30] sm:$0xff]  ;;  %v81_v48 = vld [vmem:[%s1613_s2 + $0xa8] sm:$0xff]  ;;  %v67_v49 = vld [vmem:[%s1613_s2 + $0x38] sm:$0xff] }
   0xf   :  { %170 = vperm.xlu1 %1067, %v76_v28   ;;  %100 = vperm.xlu0 %1066, %v62_v29   ;;  %v27_v50 = vld [vmem:[%s1612_s1 + $0x38] sm:$0xff]  ;;  %v45_v51 = vld [vmem:[%s1612_s1 + $0xc8] sm:$0xff]  ;;  %v82_v52 = vld [vmem:[%s1613_s2 + $0xb0] sm:$0xff] }
  0x10   :  { %903 = vmatmul.mubr.msk.f32.vlgmr.msra.gmra.mrb[0].mxu0 %vm228_vm0, %v20_v20  ;;  %921 = vmatmul.mubr.msk.f32.vlgmr.msra.gmra.mrb[0].mxu1 %vm228_vm0, %v38_v21  ;;  %v68_v53 = vld [vmem:[%s1613_s2 + $0x40] sm:$0xff]  ;;  %v46_v55 = vld [vmem:[%s1612_s1 + $0xd0] sm:$0xff]  ;;  %v83_v56 = vld [vmem:[%s1613_s2 + $0xb8] sm:$0xff] }
  0x11   :  { %383 = vmatprep.mubr.f32.mxu0 %v1068_v3  ;;  %491 = vmatprep.mubr.f32.mxu1 %v1068_v3  ;;  %v28_v54 = vld [vmem:[%s1612_s1 + $0x40] sm:$0xff]  ;;  %v69_v57 = vld [vmem:[%s1613_s2 + $0x48] sm:$0xff]  ;;  %v47_v59 = vld [vmem:[%s1612_s1 + $0xd8] sm:$0xff] }
  0x12   :  { %v29_v58 = vld [vmem:[%s1612_s1 + $0x48] sm:$0xff]  ;;  %v84_v60 = vld [vmem:[%s1613_s2 + $0xc0] sm:$0xff]  ;;  %v70_v61 = vld [vmem:[%s1613_s2 + $0x50] sm:$0xff] }
  0x13   :  { %175 = vperm.xlu1 %1067, %v77_v32   ;;  %105 = vperm.xlu0 %1066, %v63_v33   ;;  %v30_v62 = vld [vmem:[%s1612_s1 + $0x50] sm:$0xff]  ;;  %v85_v63 = vld [vmem:[%s1613_s2 + $0xc8] sm:$0xff]  ;;  %v71_v0 = vld [vmem:[%s1613_s2 + $0x58] sm:$0xff] }
  0x14   :  { %904 = vmatmul.mubr.msk.f32.gmra.mrb[2].mxu0 %vm228_vm0, %v21_v26  ;;  %922 = vmatmul.mubr.msk.f32.gmra.mrb[2].mxu1 %vm228_vm0, %v39_v27  ;;  %v31_v1 = vld [vmem:[%s1612_s1 + $0x58] sm:$0xff]  ;;  %v86_v2 = vld [vmem:[%s1613_s2 + $0xd0] sm:$0xff]  ;;  %v72_v4 = vld [vmem:[%s1613_s2 + $0x60] sm:$0xff] }
  0x15   :  { %389 = vmatprep.mubr.f32.mxu0 %v1068_v3  ;;  %497 = vmatprep.mubr.f32.mxu1 %v1068_v3  ;;  %v32_v5 = vld [vmem:[%s1612_s1 + $0x60] sm:$0xff]  ;;  %v87_v6 = vld [vmem:[%s1613_s2 + $0xd8] sm:$0xff]  ;;  %v73_v7 = vld [vmem:[%s1613_s2 + $0x68] sm:$0xff] }
  0x16   :  { %v33_v8 = vld [vmem:[%s1612_s1 + $0x68] sm:$0xff]  ;;  %v34_v9 = vld [vmem:[%s1612_s1 + $0x70] sm:$0xff]  ;;  %v35_v10 = vld [vmem:[%s1612_s1 + $0x78] sm:$0xff] }
  0x17   :  { %180 = vperm.xlu1 %1067, %v78_v36   ;;  %110 = vperm.xlu0 %1066, %v64_v37   ;;  %v36_v11 = vld [vmem:[%s1612_s1 + $0x80] sm:$0xff]  ;;  %v37_v12 = vld [vmem:[%s1612_s1 + $0x88] sm:$0xff]  ;;  %v731_v16 = vld [vmem:[%s1614_s4 + $0x18] sm:$0xff] }
  0x18   :  { %905 = vmatmul.mubr.msk.f32.gmra.mrb[4].mxu0 %vm228_vm0, %v22_v30  ;;  %923 = vmatmul.mubr.msk.f32.gmra.mrb[4].mxu1 %vm228_vm0, %v40_v31  ;;  %v728_v13 = vld [vmem:[%s1614_s4] sm:$0xff]  ;;  %v729_v14 = vld [vmem:[%s1614_s4 + $0x8] sm:$0xff]  ;;  %v734_v21 = vld [vmem:[%s1614_s4 + $0x30] sm:$0xff] }
  0x19   :  { %395 = vmatprep.mubr.f32.mxu0 %v1068_v3  ;;  %503 = vmatprep.mubr.f32.mxu1 %v1068_v3  ;;  %v1026_v15 = vpack.c.bf16 %v729_v14, %v728_v13  ;;  %v732_v18 = vld [vmem:[%s1614_s4 + $0x20] sm:$0xff]  ;;  %v733_v19 = vld [vmem:[%s1614_s4 + $0x28] sm:$0xff]  ;;  %v735_v22 = vld [vmem:[%s1614_s4 + $0x38] sm:$0xff] }
  0x1a   :  { %v1034_v20 = vpack.c.bf16 %v733_v19, %v732_v18  ;;  %v1038_v23 = vpack.c.bf16 %v735_v22, %v734_v21  ;;  %v736_v24 = vld [vmem:[%s1614_s4 + $0x40] sm:$0xff]  ;;  %v737_v25 = vld [vmem:[%s1614_s4 + $0x48] sm:$0xff]  ;;  %v738_v27 = vld [vmem:[%s1614_s4 + $0x50] sm:$0xff] }
  0x1b   :  { %185 = vperm.xlu1 %1067, %v79_v40   ;;  %115 = vperm.xlu0 %1066, %v65_v41   ;;  %v1042_v26 = vpack.c.bf16 %v737_v25, %v736_v24  ;;  %v739_v28 = vld [vmem:[%s1614_s4 + $0x58] sm:$0xff]  ;;  %v740_v30 = vld [vmem:[%s1614_s4 + $0x60] sm:$0xff]  ;;  %v741_v31 = vld [vmem:[%s1614_s4 + $0x68] sm:$0xff] }
  0x1c   :  { %906 = vmatmul.mubr.msk.f32.gmra.mrb[6].mxu0 %vm228_vm0, %v23_v34  ;;  %924 = vmatmul.mubr.msk.f32.gmra.mrb[6].mxu1 %vm228_vm0, %v41_v35  ;;  %v1046_v29 = vpack.c.bf16 %v739_v28, %v738_v27  ;;  %v1050_v32 = vpack.c.bf16 %v741_v31, %v740_v30  ;;  %v742_v33 = vld [vmem:[%s1614_s4 + $0x70] sm:$0xff]  ;;  %v743_v34 = vld [vmem:[%s1614_s4 + $0x78] sm:$0xff] }
  0x1d   :  { %401 = vmatprep.mubr.f32.mxu0 %v1068_v3  ;;  %509 = vmatprep.mubr.f32.mxu1 %v1068_v3  ;;  %v1054_v35 = vpack.c.bf16 %v743_v34, %v742_v33 }
  0x1e   :  { %1027 = vmatprep.subr.bf16.mxu1 %v1026_v15 }
  0x1f   :  { %190 = vperm.xlu1 %1067, %v80_v44   ;;  %120 = vperm.xlu0 %1066, %v66_v45  }
  0x20   :  { %907 = vmatmul.mubr.msk.f32.gmra.mrb[8].mxu0 %vm228_vm0, %v24_v38  ;;  %925 = vmatmul.mubr.msk.f32.gmra.mrb[8].mxu1 %vm228_vm0, %v42_v39 }
  0x21   :  { %407 = vmatprep.mubr.f32.mxu0 %v1068_v3  ;;  %515 = vmatprep.mubr.f32.mxu1 %v1068_v3 }
  0x22   :  { %1029 = vmatpush3.bf16.msra.mxu1 %v1026_v15 }
  0x23   :  { %195 = vperm.xlu1 %1067, %v81_v48   ;;  %125 = vperm.xlu0 %1066, %v67_v49  }
  0x24   :  { %908 = vmatmul.mubr.msk.f32.gmra.mrb[10].mxu0 %vm228_vm0, %v25_v42  ;;  %926 = vmatmul.mubr.msk.f32.gmra.mrb[10].mxu1 %vm228_vm0, %v43_v43 }
  0x25   :  { %413 = vmatprep.mubr.f32.mxu0 %v1068_v3  ;;  %521 = vmatprep.mubr.f32.mxu1 %v1068_v3 }
  0x27   :  { %200 = vperm.xlu1 %1067, %v82_v52   ;;  %130 = vperm.xlu0 %1066, %v68_v53  }
  0x28   :  { %909 = vmatmul.mubr.msk.f32.gmra.mrb[12].mxu0 %vm228_vm0, %v26_v46  ;;  %927 = vmatmul.mubr.msk.f32.gmra.mrb[12].mxu1 %vm228_vm0, %v44_v47 }
  0x29   :  { %419 = vmatprep.mubr.f32.mxu0 %v1068_v3  ;;  %527 = vmatprep.mubr.f32.mxu1 %v1068_v3 }
  0x2b   :  { %205 = vperm.xlu1 %1067, %v83_v56   ;;  %135 = vperm.xlu0 %1066, %v69_v57  }
  0x2c   :  { %910 = vmatmul.mubr.msk.f32.gmra.mrb[14].mxu0 %vm228_vm0, %v27_v50  ;;  %928 = vmatmul.mubr.msk.f32.gmra.mrb[14].mxu1 %vm228_vm0, %v45_v51 }
  0x2d   :  { %425 = vmatprep.mubr.f32.mxu0 %v1068_v3  ;;  %533 = vmatprep.mubr.f32.mxu1 %v1068_v3 }
  0x2f   :  { %210 = vperm.xlu1 %1067, %v84_v60   ;;  %140 = vperm.xlu0 %1066, %v70_v61  }
  0x30   :  { %911 = vmatmul.mubr.msk.f32.gmra.mrb[16].mxu0 %vm228_vm0, %v28_v54  ;;  %929 = vmatmul.mubr.msk.f32.gmra.mrb[16].mxu1 %vm228_vm0, %v46_v55 }
  0x31   :  { %431 = vmatprep.mubr.f32.mxu0 %v1068_v3  ;;  %539 = vmatprep.mubr.f32.mxu1 %v1068_v3 }
  0x33   :  { %215 = vperm.xlu1 %1067, %v85_v63   ;;  %145 = vperm.xlu0 %1066, %v71_v0  }
  0x34   :  { %912 = vmatmul.mubr.msk.f32.gmra.mrb[18].mxu0 %vm228_vm0, %v29_v58  ;;  %930 = vmatmul.mubr.msk.f32.gmra.mrb[18].mxu1 %vm228_vm0, %v47_v59 }
  0x35   :  { %437 = vmatprep.mubr.f32.mxu0 %v1068_v3 }
  0x37   :  { %220 = vperm.xlu1 %1067, %v86_v2   ;;  %150 = vperm.xlu0 %1066, %v72_v4  }
  0x38   :  { %913 = vmatmul.mubr.msk.f32.gmra.mrb[20].mxu0 %vm228_vm0, %v30_v62 }
  0x39   :  { %443 = vmatprep.mubr.f32.mxu0 %v1068_v3 }
  0x3b   :  { %225 = vperm.xlu1 %1067, %v87_v6   ;;  %155 = vperm.xlu0 %1066, %v73_v7  }
  0x3c   :  { %914 = vmatmul.mubr.msk.f32.gmra.mrb[22].mxu0 %vm228_vm0, %v31_v1 }
  0x3d   :  { %449 = vmatprep.mubr.f32.mxu0 %v1068_v3 }
  0x40   :  { %915 = vmatmul.mubr.msk.f32.gmra.mrb[24].mxu0 %vm228_vm0, %v32_v5 }
  0x41   :  { %455 = vmatprep.mubr.f32.mxu0 %v1068_v3 }
  0x44   :  { %916 = vmatmul.mubr.msk.f32.gmra.mrb[26].mxu0 %vm228_vm0, %v33_v8 }
  0x45   :  { %461 = vmatprep.mubr.f32.mxu0 %v1068_v3 }
  0x48   :  { %917 = vmatmul.mubr.msk.f32.gmra.mrb[28].mxu0 %vm228_vm0, %v34_v9 }
  0x49   :  { %467 = vmatprep.mubr.f32.mxu0 %v1068_v3 }
  0x4c   :  { %918 = vmatmul.mubr.msk.f32.gmra.mrb[30].mxu0 %vm228_vm0, %v35_v10 }
  0x4d   :  { %473 = vmatprep.mubr.f32.mxu0 %v1068_v3 }
  0x50   :  { %919 = vmatmul.mubr.msk.f32.gmra.mrb[32].mxu0 %vm228_vm0, %v36_v11 }
  0x51   :  { %479 = vmatprep.mubr.f32.mxu0 %v1068_v3  ;;  %v730_v3 = vld [vmem:[%s1614_s4 + $0x10] sm:$0xff] }
  0x52   :  { %v1030_v17 = vpack.c.bf16 %v731_v16, %v730_v3 }
  0x54   :  { %920 = vmatmul.mubr.msk.f32.gmra.mrb[34].mxu0 %vm228_vm0, %v37_v12  ;;  %1031 = vmatprep.subr.bf16.mxu1 %v1030_v17 }
  0x55   :  { %1033 = vmatpush3.bf16.msra.mxu1 %v1030_v17 }
  0x56   :  { %1035 = vmatprep.subr.bf16.mxu1 %v1034_v20 }
  0x59   :  { %1037 = vmatpush3.bf16.msra.mxu1 %v1034_v20 }
  0x5a   :  { %1039 = vmatprep.subr.bf16.mxu1 %v1038_v23 }
  0x5d   :  { %1041 = vmatpush3.bf16.msra.mxu1 %v1038_v23 }
  0x5e   :  { %1043 = vmatprep.subr.bf16.mxu1 %v1042_v26 }
  0x61   :  { %1045 = vmatpush3.bf16.msra.mxu1 %v1042_v26 }
  0x62   :  { %1047 = vmatprep.subr.bf16.mxu1 %v1046_v29 }
  0x65   :  { %1049 = vmatpush3.bf16.msra.mxu1 %v1046_v29 }
  0x66   :  { %1051 = vmatprep.subr.bf16.mxu1 %v1050_v32 }
  0x69   :  { %1053 = vmatpush3.bf16.msra.mxu1 %v1050_v32 }
  0x6a   :  { %1055 = vmatprep.subr.bf16.mxu1 %v1054_v35 }
  0x6d   :  { %1057 = vmatpush3.bf16.msra.mxu1 %v1054_v35 }
  0x86   :  { %v96_v36 = vpop.permute.xlu1 %95  ;;  %v91_v39 = vpop.permute.xlu0 %90 }
  0x8a   :  { %v1408_v37 = vpop.permute.xlu1 %165  ;;  %v1414_v41 = vpop.permute.xlu0 %160 }
  0x8e   :  { %v1410_v38 = vpop.permute.xlu1 %170  ;;  %v101_v43 = vpop.permute.xlu0 %100 }
  0x92   :  { %v1412_v40 = vpop.permute.xlu1 %175  ;;  %v1416_v45 = vpop.permute.xlu0 %105 }
  0x96   :  { %v181_v42 = vpop.permute.xlu1 %180  ;;  %v1418_v47 = vpop.permute.xlu0 %110 }
  0x9a   :  { %v186_v44 = vpop.permute.xlu1 %185  ;;  %v1422_v49 = vpop.permute.xlu0 %115 }
  0x9e   :  { %v191_v46 = vpop.permute.xlu1 %190  ;;  %v1426_v60 = vpop.permute.xlu0 %120 }
  0xa2   :  { %v1420_v48 = vpop.permute.xlu1 %195  ;;  %v1434_v32 = vpop.permute.xlu0 %125 }
  0xa6   :  { %v1424_v50 = vpop.permute.xlu1 %200 }
  0xaa   :  { %v1428_v62 = vpop.permute.xlu1 %205 }
  0xae   :  { %v1436_v34 = vpop.permute.xlu1 %210 }
  0xe3   :  { %v379_v51 = vpop.f32.mrb[0].mxu0  ;;  %v487_v52 = vpop.f32.mrb[0].mxu1 }
  0xe4   :  { %v380_v53 = vadd.f32 %v379_v51, %v91_v39  ;;  %v381_v54 = vpop.f32.mrb[1].mxu0  ;;  %v488_v55 = vadd.f32 %v487_v52, %v181_v42  ;;  %v489_v56 = vpop.f32.mrb[1].mxu1 }
  0xe5   :  { %v382_v57 = vadd.f32 %v381_v54, %v91_v39  ;;  %v490_v58 = vadd.f32 %v489_v56, %v181_v42 }
  0xe6   :  { %v546_v59 = vmul.f32 0.1, %v380_v53  ;;  %v582_v61 = vmul.f32 0.1, %v488_v55 }
  0xe7   :  { %v547_v63 = vmul.f32 0.1, %v382_v57  ;;  %v385_v0 = vpop.f32.mrb[2].mxu0  ;;  %v583_v1 = vmul.f32 0.1, %v490_v58  ;;  %v493_v2 = vpop.f32.mrb[2].mxu1 }
  0xe8   :  { %v602_v4 = vmax.f32 %v380_v53, %v546_v59  ;;  %v386_v5 = vadd.f32 %v385_v0, %v96_v36  ;;  %v387_v6 = vpop.f32.mrb[3].mxu0  ;;  %v638_v7 = vmax.f32 %v488_v55, %v582_v61  ;;  %v494_v8 = vadd.f32 %v493_v2, %v186_v44  ;;  %v495_v9 = vpop.f32.mrb[3].mxu1 }
  0xe9   :  { %v603_v10 = vmax.f32 %v382_v57, %v547_v63  ;;  %v388_v11 = vadd.f32 %v387_v6, %v96_v36  ;;  %v639_v12 = vmax.f32 %v490_v58, %v583_v1  ;;  %v496_v13 = vadd.f32 %v495_v9, %v186_v44 }
  0xea   :  { %v548_v14 = vmul.f32 0.1, %v386_v5  ;;  %v584_v15 = vmul.f32 0.1, %v494_v8 }
  0xeb   :  { %v1430_v3 = vmax.f32 %v602_v4, %v603_v10  ;;  %v549_v16 = vmul.f32 0.1, %v388_v11  ;;  %v391_v17 = vpop.f32.mrb[4].mxu0  ;;  %v1432_v18 = vmax.f32 %v638_v7, %v639_v12  ;;  %v585_v19 = vmul.f32 0.1, %v496_v13  ;;  %v499_v20 = vpop.f32.mrb[4].mxu1 }
  0xec   :  { %v604_v21 = vmax.f32 %v386_v5, %v548_v14  ;;  %v392_v22 = vadd.f32 %v391_v17, %v101_v43  ;;  %v393_v23 = vpop.f32.mrb[5].mxu0  ;;  %v640_v24 = vmax.f32 %v494_v8, %v584_v15  ;;  %v500_v25 = vadd.f32 %v499_v20, %v191_v46  ;;  %v501_v26 = vpop.f32.mrb[5].mxu1 }
  0xed   :  { %v605_v27 = vmax.f32 %v388_v11, %v549_v16  ;;  %v394_v28 = vadd.f32 %v393_v23, %v101_v43  ;;  %v641_v29 = vmax.f32 %v496_v13, %v585_v19  ;;  %v502_v30 = vadd.f32 %v501_v26, %v191_v46  ;;  %v1454_v16 = vpop.permute.xlu0 %130  ;;  %v216_v19 = vpop.permute.xlu1 %215 }
  0xee   :  { %v550_v31 = vmul.f32 0.1, %v392_v22  ;;  %v586_v33 = vmul.f32 0.1, %v500_v25 }
  0xef   :  { %v1438_v35 = vmax.f32 %v604_v21, %v605_v27  ;;  %v551_v36 = vmul.f32 0.1, %v394_v28  ;;  %v397_v39 = vpop.f32.mrb[6].mxu0  ;;  %v1440_v42 = vmax.f32 %v640_v24, %v641_v29  ;;  %v587_v44 = vmul.f32 0.1, %v502_v30  ;;  %v505_v51 = vpop.f32.mrb[6].mxu1 }
  0xf0   :  { %v606_v52 = vmax.f32 %v392_v22, %v550_v31  ;;  %v398_v53 = vadd.f32 %v397_v39, %v1416_v45  ;;  %v399_v43 = vpop.f32.mrb[7].mxu0  ;;  %v642_v54 = vmax.f32 %v500_v25, %v586_v33  ;;  %v506_v46 = vadd.f32 %v505_v51, %v1420_v48  ;;  %v507_v55 = vpop.f32.mrb[7].mxu1 }
  0xf1   :  { %v607_v56 = vmax.f32 %v394_v28, %v551_v36  ;;  %v400_v57 = vadd.f32 %v399_v43, %v1416_v45  ;;  %v643_v58 = vmax.f32 %v502_v30, %v587_v44  ;;  %v508_v59 = vadd.f32 %v507_v55, %v1420_v48 }
  0xf2   :  { %v552_v61 = vmul.f32 0.1, %v398_v53  ;;  %v588_v63 = vmul.f32 0.1, %v506_v46 }
  0xf3   :  { %v1446_v0 = vmax.f32 %v606_v52, %v607_v56  ;;  %v553_v1 = vmul.f32 0.1, %v400_v57  ;;  %v403_v2 = vpop.f32.mrb[8].mxu0  ;;  %v1448_v4 = vmax.f32 %v642_v54, %v643_v58  ;;  %v589_v5 = vmul.f32 0.1, %v508_v59  ;;  %v511_v6 = vpop.f32.mrb[8].mxu1 }
  0xf4   :  { %v608_v7 = vmax.f32 %v398_v53, %v552_v61  ;;  %v404_v8 = vadd.f32 %v403_v2, %v1418_v47  ;;  %v405_v9 = vpop.f32.mrb[9].mxu0  ;;  %v644_v10 = vmax.f32 %v506_v46, %v588_v63  ;;  %v512_v45 = vadd.f32 %v511_v6, %v1424_v50  ;;  %v513_v11 = vpop.f32.mrb[9].mxu1 }
  0xf5   :  { %v609_v12 = vmax.f32 %v400_v57, %v553_v1  ;;  %v406_v48 = vadd.f32 %v405_v9, %v1418_v47  ;;  %v645_v13 = vmax.f32 %v508_v59, %v589_v5  ;;  %v514_v14 = vadd.f32 %v513_v11, %v1424_v50  ;;  %v136_v2 = vpop.permute.xlu0 %135 }
  0xf6   :  { %v554_v15 = vmul.f32 0.1, %v404_v8  ;;  %v590_v17 = vmul.f32 0.1, %v512_v45 }
  0xf7   :  { %v1456_v20 = vmax.f32 %v608_v7, %v609_v12  ;;  %v555_v21 = vmul.f32 0.1, %v406_v48  ;;  %v409_v22 = vpop.f32.mrb[10].mxu0  ;;  %v1458_v23 = vmax.f32 %v644_v10, %v645_v13  ;;  %v591_v24 = vmul.f32 0.1, %v514_v14  ;;  %v517_v25 = vpop.f32.mrb[10].mxu1 }
  0xf8   :  { %v610_v26 = vmax.f32 %v404_v8, %v554_v15  ;;  %v410_v27 = vadd.f32 %v409_v22, %v1422_v49  ;;  %v411_v47 = vpop.f32.mrb[11].mxu0  ;;  %v646_v28 = vmax.f32 %v512_v45, %v590_v17  ;;  %v518_v50 = vadd.f32 %v517_v25, %v1428_v62  ;;  %v519_v29 = vpop.f32.mrb[11].mxu1 }
  0xf9   :  { %v611_v30 = vmax.f32 %v406_v48, %v555_v21  ;;  %v412_v31 = vadd.f32 %v411_v47, %v1422_v49  ;;  %v647_v33 = vmax.f32 %v514_v14, %v591_v24  ;;  %v520_v36 = vadd.f32 %v519_v29, %v1428_v62  ;;  %v221_v7 = vpop.permute.xlu1 %220 }
  0xfa   :  { %v556_v39 = vmul.f32 0.1, %v410_v27  ;;  %v592_v44 = vmul.f32 0.1, %v518_v50 }
  0xfb   :  { %v1464_v51 = vmax.f32 %v610_v26, %v611_v30  ;;  %v557_v52 = vmul.f32 0.1, %v412_v31  ;;  %v415_v53 = vpop.f32.mrb[12].mxu0  ;;  %v1466_v43 = vmax.f32 %v646_v28, %v647_v33  ;;  %v593_v54 = vmul.f32 0.1, %v520_v36  ;;  %v523_v46 = vpop.f32.mrb[12].mxu1 }
  0xfc   :  { %v612_v55 = vmax.f32 %v410_v27, %v556_v39  ;;  %v416_v56 = vadd.f32 %v415_v53, %v1426_v60  ;;  %v417_v57 = vpop.f32.mrb[13].mxu0  ;;  %v648_v58 = vmax.f32 %v518_v50, %v592_v44  ;;  %v524_v49 = vadd.f32 %v523_v46, %v1436_v34  ;;  %v525_v59 = vpop.f32.mrb[13].mxu1 }
  0xfd   :  { %v613_v61 = vmax.f32 %v412_v31, %v557_v52  ;;  %v418_v62 = vadd.f32 %v417_v57, %v1426_v60  ;;  %v649_v63 = vmax.f32 %v520_v36, %v593_v54  ;;  %v526_v1 = vadd.f32 %v525_v59, %v1436_v34  ;;  %v141_v53 = vpop.permute.xlu0 %140  ;;  %v226_v57 = vpop.permute.xlu1 %225 }
  0xfe   :  { %v558_v5 = vmul.f32 0.1, %v416_v56  ;;  %v594_v6 = vmul.f32 0.1, %v524_v49  ;;  %v690_v8 = vmax.f32 %v1464_v51, %v1432_v18  ;;  %v707_v18 = vld [vmem:[%s1615_s3 + $0x38] sm:$0xff]  ;;  %v708_v51 = vld [vmem:[%s1615_s3 + $0x40] sm:$0xff] }
  0xff   :  { %v1474_v9 = vmax.f32 %v612_v55, %v613_v61  ;;  %v559_v10 = vmul.f32 0.1, %v418_v62  ;;  %v421_v45 = vpop.f32.mrb[14].mxu0  ;;  %v1476_v11 = vmax.f32 %v648_v58, %v649_v63  ;;  %v595_v12 = vmul.f32 0.1, %v526_v1  ;;  %v529_v48 = vpop.f32.mrb[14].mxu1 }
 0x100   :  { %v614_v13 = vmax.f32 %v416_v56, %v558_v5  ;;  %v422_v60 = vadd.f32 %v421_v45, %v1434_v32  ;;  %v423_v14 = vpop.f32.mrb[15].mxu0  ;;  %v650_v34 = vmax.f32 %v524_v49, %v594_v6  ;;  %v530_v15 = vadd.f32 %v529_v48, %v216_v19  ;;  %v531_v17 = vpop.f32.mrb[15].mxu1 }
 0x101   :  { %v615_v21 = vmax.f32 %v418_v62, %v559_v10  ;;  %v424_v22 = vadd.f32 %v423_v14, %v1434_v32  ;;  %v651_v24 = vmax.f32 %v526_v1, %v595_v12  ;;  %v532_v25 = vadd.f32 %v531_v17, %v216_v19 }
 0x102   :  { %v560_v26 = vmul.f32 0.1, %v422_v60  ;;  %v596_v27 = vmul.f32 0.1, %v530_v15  ;;  %v691_v47 = vmax.f32 %v1474_v9, %v1440_v42  ;;  %v710_v9 = vld [vmem:[%s1615_s3 + $0x50] sm:$0xff] }
 0x103   :  { %v1482_v28 = vmax.f32 %v614_v13, %v615_v21  ;;  %v561_v50 = vmul.f32 0.1, %v424_v22  ;;  %v1484_v29 = vmax.f32 %v650_v34, %v651_v24  ;;  %v427_v30 = vpop.f32.mrb[16].mxu0  ;;  %v597_v31 = vmul.f32 0.1, %v532_v25  ;;  %v535_v33 = vpop.f32.mrb[16].mxu1 }
 0x104   :  { %v616_v36 = vmax.f32 %v422_v60, %v560_v26  ;;  %v428_v39 = vadd.f32 %v427_v30, %v1454_v16  ;;  %v652_v44 = vmax.f32 %v530_v15, %v596_v27  ;;  %v429_v32 = vpop.f32.mrb[17].mxu0  ;;  %v536_v52 = vadd.f32 %v535_v33, %v221_v7  ;;  %v537_v19 = vpop.f32.mrb[17].mxu1 }
 0x105   :  { %v617_v54 = vmax.f32 %v424_v22, %v561_v50  ;;  %v430_v46 = vadd.f32 %v429_v32, %v1454_v16  ;;  %v653_v55 = vmax.f32 %v532_v25, %v597_v31  ;;  %v538_v56 = vadd.f32 %v537_v19, %v221_v7  ;;  %v146_v22 = vpop.permute.xlu0 %145 }
 0x106   :  { %v562_v58 = vmul.f32 0.1, %v428_v39  ;;  %v598_v49 = vmul.f32 0.1, %v536_v52  ;;  %v692_v59 = vmax.f32 %v1482_v28, %v1448_v4  ;;  %v709_v4 = vld [vmem:[%s1615_s3 + $0x48] sm:$0xff]  ;;  %v712_v28 = vld [vmem:[%s1615_s3 + $0x60] sm:$0xff] }
 0x107   :  { %v1490_v61 = vmax.f32 %v616_v36, %v617_v54  ;;  %v563_v62 = vmul.f32 0.1, %v430_v46  ;;  %v1492_v63 = vmax.f32 %v652_v44, %v653_v55  ;;  %v599_v1 = vmul.f32 0.1, %v538_v56  ;;  %v433_v5 = vpop.f32.mrb[18].mxu0  ;;  %v541_v6 = vpop.f32.mrb[18].mxu1 }
 0x108   :  { %v618_v10 = vmax.f32 %v428_v39, %v562_v58  ;;  %v654_v45 = vmax.f32 %v536_v52, %v598_v49  ;;  %v434_v12 = vadd.f32 %v433_v5, %v136_v2  ;;  %v542_v16 = vadd.f32 %v541_v6, %v226_v57  ;;  %v435_v48 = vpop.f32.mrb[19].mxu0  ;;  %v543_v7 = vpop.f32.mrb[19].mxu1 }
 0x109   :  { %v619_v13 = vmax.f32 %v430_v46, %v563_v62  ;;  %v655_v60 = vmax.f32 %v538_v56, %v599_v1  ;;  %v436_v14 = vadd.f32 %v435_v48, %v136_v2  ;;  %v544_v34 = vadd.f32 %v543_v7, %v226_v57  ;;  %v151_v49 = vpop.permute.xlu0 %150 }
 0x10a   :  { %v564_v15 = vmul.f32 0.1, %v434_v12  ;;  %v600_v17 = vmul.f32 0.1, %v542_v16  ;;  %v693_v21 = vmax.f32 %v1490_v61, %v1458_v23 }
 0x10b   :  { %v1496_v24 = vmax.f32 %v618_v10, %v619_v13  ;;  %v1498_v25 = vmax.f32 %v654_v45, %v655_v60  ;;  %v565_v26 = vmul.f32 0.1, %v436_v14  ;;  %v601_v27 = vmul.f32 0.1, %v544_v34  ;;  %v439_v50 = vpop.f32.mrb[20].mxu0 }
 0x10c   :  { %v620_v30 = vmax.f32 %v434_v12, %v564_v15  ;;  %v656_v31 = vmax.f32 %v542_v16, %v600_v17  ;;  %v440_v33 = vadd.f32 %v439_v50, %v141_v53  ;;  %v441_v36 = vpop.f32.mrb[21].mxu0 }
 0x10d   :  { %v621_v39 = vmax.f32 %v436_v14, %v565_v26  ;;  %v657_v2 = vmax.f32 %v544_v34, %v601_v27  ;;  %v442_v44 = vadd.f32 %v441_v36, %v141_v53  ;;  %v694_v32 = vmax.f32 %v1496_v24, %v1466_v43  ;;  %v156_v34 = vpop.permute.xlu0 %155  ;;  %v711_v43 = vld [vmem:[%s1615_s3 + $0x58] sm:$0xff] }
 0x10e   :  { %v566_v52 = vmul.f32 0.1, %v440_v33 }
 0x10f   :  { %v1502_v19 = vmax.f32 %v620_v30, %v621_v39  ;;  %v1504_v54 = vmax.f32 %v656_v31, %v657_v2  ;;  %v567_v46 = vmul.f32 0.1, %v442_v44  ;;  %v445_v55 = vpop.f32.mrb[22].mxu0  ;;  %v722_v42 = vmul.f32 %v708_v51, %v694_v32 }
 0x110   :  { %v622_v56 = vmax.f32 %v440_v33, %v566_v52  ;;  %v446_v57 = vadd.f32 %v445_v55, %v146_v22  ;;  %v447_v58 = vpop.f32.mrb[23].mxu0 }
 0x111   :  { %v623_v62 = vmax.f32 %v442_v44, %v567_v46  ;;  %v448_v1 = vadd.f32 %v447_v58, %v146_v22  ;;  %v695_v5 = vmax.f32 %v1502_v19, %v1476_v11 }
 0x112   :  { %v568_v53 = vmul.f32 0.1, %v446_v57 }
 0x113   :  { %v1508_v6 = vmax.f32 %v622_v56, %v623_v62  ;;  %v569_v10 = vmul.f32 0.1, %v448_v1  ;;  %v451_v45 = vpop.f32.mrb[24].mxu0 }
 0x114   :  { %v624_v12 = vmax.f32 %v446_v57, %v568_v53  ;;  %v452_v16 = vadd.f32 %v451_v45, %v151_v49  ;;  %v453_v48 = vpop.f32.mrb[25].mxu0 }
 0x115   :  { %v625_v7 = vmax.f32 %v448_v1, %v569_v10  ;;  %v454_v13 = vadd.f32 %v453_v48, %v151_v49  ;;  %v696_v60 = vmax.f32 %v1508_v6, %v1484_v29  ;;  %v713_v29 = vld [vmem:[%s1615_s3 + $0x68] sm:$0xff] }
 0x116   :  { %v570_v14 = vmul.f32 0.1, %v452_v16 }
 0x117   :  { %v1512_v15 = vmax.f32 %v624_v12, %v625_v7  ;;  %v571_v17 = vmul.f32 0.1, %v454_v13  ;;  %v457_v22 = vpop.f32.mrb[26].mxu0  ;;  %v724_v23 = vmul.f32 %v710_v9, %v696_v60 }
 0x118   :  { %v626_v26 = vmax.f32 %v452_v16, %v570_v14  ;;  %v458_v27 = vadd.f32 %v457_v22, %v156_v34  ;;  %v459_v50 = vpop.f32.mrb[27].mxu0 }
 0x119   :  { %v627_v30 = vmax.f32 %v454_v13, %v571_v17  ;;  %v460_v31 = vadd.f32 %v459_v50, %v156_v34  ;;  %v697_v33 = vmax.f32 %v1512_v15, %v1492_v63 }
 0x11a   :  { %v572_v36 = vmul.f32 0.1, %v458_v27 }
 0x11b   :  { %v1516_v39 = vmax.f32 %v626_v26, %v627_v30  ;;  %v573_v2 = vmul.f32 0.1, %v460_v31  ;;  %v463_v44 = vpop.f32.mrb[28].mxu0 }
 0x11c   :  { %v628_v52 = vmax.f32 %v458_v27, %v572_v36  ;;  %v464_v46 = vadd.f32 %v463_v44, %v1414_v41  ;;  %v465_v55 = vpop.f32.mrb[29].mxu0  ;;  %v700_v27 = vld [vmem:[%s1615_s3] sm:$0xff] }
 0x11d   :  { %v629_v56 = vmax.f32 %v460_v31, %v573_v2  ;;  %v466_v57 = vadd.f32 %v465_v55, %v1414_v41  ;;  %v698_v58 = vmax.f32 %v1516_v39, %v1498_v25 }
 0x11e   :  { %v574_v49 = vmul.f32 0.1, %v464_v46 }
 0x11f   :  { %v1522_v62 = vmax.f32 %v628_v52, %v629_v56  ;;  %v575_v1 = vmul.f32 0.1, %v466_v57  ;;  %v469_v53 = vpop.f32.mrb[30].mxu0  ;;  %v726_v11 = vmul.f32 %v712_v28, %v698_v58 }
 0x120   :  { %v630_v10 = vmax.f32 %v464_v46, %v574_v49  ;;  %v470_v45 = vadd.f32 %v469_v53, %v1408_v37  ;;  %v471_v12 = vpop.f32.mrb[31].mxu0  ;;  %v701_v46 = vld [vmem:[%s1615_s3 + $0x8] sm:$0xff] }
 0x121   :  { %v631_v16 = vmax.f32 %v466_v57, %v575_v1  ;;  %v472_v48 = vadd.f32 %v471_v12, %v1408_v37  ;;  %v699_v7 = vmax.f32 %v1522_v62, %v1504_v54 }
 0x122   :  { %v576_v13 = vmul.f32 0.1, %v470_v45 }
 0x123   :  { %v672_v41 = vmax.f32 %v630_v10, %v631_v16  ;;  %v577_v14 = vmul.f32 0.1, %v472_v48  ;;  %v475_v34 = vpop.f32.mrb[32].mxu0  ;;  %v702_v16 = vld [vmem:[%s1615_s3 + $0x10] sm:$0xff]  ;;  %v727_v61 = vmul.f32 %v713_v29, %v699_v7 }
 0x124   :  { %v632_v17 = vmax.f32 %v470_v45, %v576_v13  ;;  %v476_v22 = vadd.f32 %v475_v34, %v1410_v38  ;;  %v477_v26 = vpop.f32.mrb[33].mxu0  ;;  %v704_v34 = vld [vmem:[%s1615_s3 + $0x20] sm:$0xff] }
 0x125   :  { %v633_v50 = vmax.f32 %v472_v48, %v577_v14  ;;  %v478_v30 = vadd.f32 %v477_v26, %v1410_v38  ;;  %v686_v37 = vmax.f32 %v1430_v3, %v672_v41  ;;  %v706_v26 = vld [vmem:[%s1615_s3 + $0x30] sm:$0xff] }
 0x126   :  { %v578_v31 = vmul.f32 0.1, %v476_v22 }
 0x127   :  { %v673_v36 = vmax.f32 %v632_v17, %v633_v50  ;;  %v579_v2 = vmul.f32 0.1, %v478_v30  ;;  %v481_v44 = vpop.f32.mrb[34].mxu0  ;;  %v714_v52 = vmul.f32 %v700_v27, %v686_v37  ;;  %v720_v27 = vmul.f32 %v706_v26, %v692_v59 }
 0x128   :  { %v634_v55 = vmax.f32 %v476_v22, %v578_v31  ;;  %v482_v56 = vadd.f32 %v481_v44, %v1412_v40  ;;  %v483_v57 = vpop.f32.mrb[35].mxu0  ;;  %v718_v22 = vmul.f32 %v704_v34, %v690_v8  ;;  %v721_v8 = vmul.f32 %v707_v18, %v693_v21 }
 0x129   :  { %v687_v49 = vmax.f32 %v1438_v35, %v673_v36  ;;  %v635_v1 = vmax.f32 %v478_v30, %v579_v2  ;;  %v484_v38 = vadd.f32 %v483_v57, %v1412_v40  ;;  %993 = vmatprep.mubr.f32.mxu1 %v714_v52  ;;  %v703_v40 = vld [vmem:[%s1615_s3 + $0x18] sm:$0xff]  ;;  %v725_v59 = vmul.f32 %v711_v43, %v697_v33 }
 0x12a   :  { %v580_v3 = vmul.f32 0.1, %v482_v56 }
 0x12b   :  { %v715_v53 = vmul.f32 %v701_v46, %v687_v49  ;;  %v674_v10 = vmax.f32 %v634_v55, %v635_v1  ;;  %v581_v45 = vmul.f32 0.1, %v484_v38 }
 0x12c   :  { %v636_v12 = vmax.f32 %v482_v56, %v580_v3 }
 0x12d   :  { %v637_v48 = vmax.f32 %v484_v38, %v581_v45  ;;  %994 = vmatmul.mubr.f32.vlgmr.msra.gmra.mrb[20].mxu1 %v715_v53  ;;  %v688_v13 = vmax.f32 %v1446_v0, %v674_v10  ;;  %v705_v0 = vld [vmem:[%s1615_s3 + $0x28] sm:$0xff] }
 0x12f   :  { %v675_v41 = vmax.f32 %v636_v12, %v637_v48  ;;  %v716_v14 = vmul.f32 %v702_v16, %v688_v13 }
 0x131   :  { %996 = vmatprep.mubr.f32.mxu1 %v716_v14  ;;  %v689_v35 = vmax.f32 %v1456_v20, %v675_v41  ;;  %v719_v20 = vmul.f32 %v705_v0, %v691_v47  ;;  %v723_v47 = vmul.f32 %v709_v4, %v695_v5 }
 0x133   :  { %v717_v17 = vmul.f32 %v703_v40, %v689_v35 }
 0x135   :  { %997 = vmatmul.mubr.f32.gmra.mrb[22].mxu1 %v717_v17 }
 0x136   :  { %999 = vmatprep.mubr.f32.mxu1 %v718_v22 }
 0x139   :  { %1000 = vmatmul.mubr.f32.gmra.mrb[24].mxu1 %v719_v20 }
 0x13a   :  { %1002 = vmatprep.mubr.f32.mxu1 %v720_v27 }
 0x13d   :  { %1003 = vmatmul.mubr.f32.gmra.mrb[26].mxu1 %v721_v8 }
 0x13e   :  { %1005 = vmatprep.mubr.f32.mxu1 %v722_v42 }
 0x141   :  { %1006 = vmatmul.mubr.f32.gmra.mrb[28].mxu1 %v723_v47 }
 0x142   :  { %1008 = vmatprep.mubr.f32.mxu1 %v724_v23 }
 0x145   :  { %1009 = vmatmul.mubr.f32.gmra.mrb[30].mxu1 %v725_v59 }
 0x146   :  { %1011 = vmatprep.mubr.f32.mxu1 %v726_v11 }
 0x149   :  { %1012 = vmatmul.mubr.f32.gmra.mrb[32].mxu1 %v727_v61 }
 0x200   :  { %v995_v21 = vpop.f32.mrb[20].mxu1 }
 0x201   :  { %v810_v24 = vpop.f32.mrb[21].mxu1 }
 0x202   :  { %v879_v32 = vadd.f32 %v995_v21, %v810_v24 }
 0x208   :  { %v998_v63 = vpop.f32.mrb[22].mxu1 }
 0x209   :  { %v820_v19 = vpop.f32.mrb[23].mxu1 }
 0x20a   :  { %v880_v5 = vadd.f32 %v879_v32, %v820_v19 }
 0x20c   :  { %v1001_v6 = vpop.f32.mrb[24].mxu1  ;;  %v881_v25 = vadd.f32 %v998_v63, %v880_v5 }
 0x20d   :  { %v830_v60 = vpop.f32.mrb[25].mxu1 }
 0x20e   :  { %v882_v15 = vadd.f32 %v881_v25, %v830_v60 }
 0x210   :  { %v1004_v33 = vpop.f32.mrb[26].mxu1  ;;  %v883_v39 = vadd.f32 %v1001_v6, %v882_v15 }
 0x211   :  { %v840_v58 = vpop.f32.mrb[27].mxu1 }
 0x212   :  { %v884_v50 = vadd.f32 %v883_v39, %v840_v58 }
 0x214   :  { %v1007_v30 = vpop.f32.mrb[28].mxu1  ;;  %v885_v37 = vadd.f32 %v1004_v33, %v884_v50 }
 0x215   :  { %v850_v31 = vpop.f32.mrb[29].mxu1 }
 0x216   :  { %v886_v54 = vadd.f32 %v885_v37, %v850_v31 }
 0x218   :  { %v1010_v62 = vpop.f32.mrb[30].mxu1  ;;  %v887_v7 = vadd.f32 %v1007_v30, %v886_v54 }
 0x219   :  { %v860_v36 = vpop.f32.mrb[31].mxu1 }
 0x21a   :  { %v888_v2 = vadd.f32 %v887_v7, %v860_v36 }
 0x21c   :  { %v1013_v44 = vpop.f32.mrb[32].mxu1  ;;  %v889_v52 = vadd.f32 %v1010_v62, %v888_v2 }
 0x21d   :  { %v870_v46 = vpop.f32.mrb[33].mxu1 }
 0x21e   :  { %v890_v55 = vadd.f32 %v889_v52, %v870_v46 }
 0x220   :  { %v891_v56 = vadd.f32 %v1013_v44, %v890_v55 }
 0x222   :  { %v892_v57 = vrot.slane %v891_v56, 4 }
 0x224   :  { %v893_v49 = vadd.f32 %v892_v57, %v891_v56 }
 0x226   :  { %v894_v1 = vrot.slane %v893_v49, 2 }
 0x228   :  { %v895_v38 = vadd.f32 %v894_v1, %v893_v49 }
 0x22a   :  { %v896_v3 = vrot.slane %v895_v38, 1 }
 0x22c   :  { %v897_v53 = vadd.f32 %v896_v3, %v895_v38 }
 0x22e   :  { %898 = vst [vmem:[%s1616_s5] sm:$0x1] %v897_v53 }

</bundles_post_ra>
